<compile_context>
chip_gen: v5e
topology: v5e:2x2
jax: 0.10.0
libtpu: 0.0.40
codegen_flags: <defaults>
</compile_context>

<pallas_src>
import functools

import jax
import jax.numpy as jnp
from jax.experimental import pallas as pl
from jax.experimental.pallas import tpu as pltpu


def _moments_kernel(x_ref, g_ref, m_ref, *, matmul_dtype):
    """Accumulate per-batch sufficient statistics of x over N-tiles.

    x_ref: (1, C, TN)    input tile (channels-first, N on the 128-lane axis)
    g_ref: (1, 1, C, C)  G_b = x x^T   (output block resident across N-tiles)
    m_ref: (1, 1, C, 1)  m_b = x @ 1   (row sums)
    Accumulates directly into the resident output blocks (no scratch).
    """
    nt = pl.program_id(2)

    @pl.when(nt == 0)
    def _():
        g_ref[...] = jnp.zeros_like(g_ref)
        m_ref[...] = jnp.zeros_like(m_ref)

    x = x_ref[0]                                            # (C, TN)
    xm = x.astype(matmul_dtype)
    # G += x x^T: contract the lane/N axis directly (no transposed copies).
    g_ref[0, 0] = g_ref[0, 0] + jax.lax.dot_general(
        xm, xm, dimension_numbers=(((1,), (1,)), ((), ())),
        preferred_element_type=jnp.float32)
    m_ref[0, 0] = m_ref[0, 0] + jnp.sum(
        x.astype(jnp.float32), axis=1, keepdims=True)


def _output_kernel(a_ref, d_ref, x_ref, z_ref, *, matmul_dtype):
    """z = A_b @ x + d_b + x — one fused matmul per tile (attention, W conv
    and BatchNorm scale/shift all folded into A_b / d_b), plus the residual.

    a_ref: (1, C, C)   A_b = diag(gamma * inv_std) @ w_W @ S_b @ w_theta
    d_ref: (1, C, 1)   d_b = gamma * inv_std * (c_b - mean) + beta
    x_ref: (1, C, TN)
    z_ref: (1, C, TN)  final output tile (lane-dense store)
    """
    x = x_ref[0]                                            # (C, TN)
    wy = jnp.dot(a_ref[0].astype(matmul_dtype), x.astype(matmul_dtype),
                 preferred_element_type=jnp.float32)        # (C, TN)
    # Residual adds the same x the kernel reads; exact when matmul_dtype=f32,
    # bf16-rounded residual otherwise (documented precision trade for the
    # halved HBM read in production-size bf16 mode).
    z_ref[0] = wy + d_ref[0] + x.astype(jnp.float32)


def _pick_n_tile(n, c, in_bytes, out_bytes, budget_bytes):
    """Largest TN (multiple of 128 dividing N, up to N) whose double-buffered
    input + output tiles fit a per-generation-safe VMEM budget."""
    if n % 128 != 0:
        # TODO(synk): padded/masked N-tiling for N not divisible by 128; the
        # full-extent block below is correct but unpipelined along N.
        return n
    per_col = 2 * c * (in_bytes + out_bytes)       # double-buffered in + out
    max_tn = max(128, budget_bytes // max(per_col, 1))
    tn = min(n, (max_tn // 128) * 128)
    while n % tn != 0:
        tn -= 128
    return tn


def non_local_attention(x_nchw, params, *, matmul_dtype=None,
                        vmem_budget_bytes=8 << 20):
    """Forward pass of Non_local_attention.  x_nchw: (B, C, H, W) float32."""
    B, C, H, W = x_nchw.shape
    N = H * W
    if matmul_dtype is None:
        # HBM-bound kernels: bf16 operands for production channel counts halve
        # the dominant x read and run the MXU at its bf16 rate on all
        # generations (v7x has no reduced-precision int path).  Tiny channel
        # counts (like the test) stay f32 — they are VPU-bound anyway.
        matmul_dtype = jnp.bfloat16 if C >= 128 else jnp.float32

    in_bytes = jnp.dtype(matmul_dtype).itemsize
    TN = _pick_n_tile(N, C, in_bytes, 4, vmem_budget_bytes)
    NT = N // TN
    # v7x has 2 TensorCores: guarantee a parallel grid axis of extent >= 2
    # even when B == 1 by splitting the N-tile range into two parallel halves
    # (partial moments are reduced in the wrapper).  No-op on v5e/v6e.
    P = 2 if (B == 1 and NT % 2 == 0) else 1
    NTI = NT // P

    # (B, C, H, W) -> (B, C, N) is a pure reshape (no HBM transpose pass); N
    # sits on the 128-lane axis so every tile load/store is lane-dense.
    x_bcn = x_nchw.reshape(B, C, N)
    x_mm = x_bcn.astype(matmul_dtype)      # stored once; read by both kernels

    x_spec = pl.BlockSpec((1, C, TN), lambda b, p, n: (b, 0, p * NTI + n))
    vmem_limit = 32 * 1024 * 1024          # safe on v5e/v6e/v7x; > v5e default

    # ---- Kernel 1: per-batch moments G_b = x x^T, m_b = x @ 1 (1 read of x).
    # Note: the resident (C, C) output block is ~C^2*4 bytes; fine for typical
    # non-local channel counts (C <= 1024).
    g_parts, m_parts = pl.pallas_call(
        functools.partial(_moments_kernel, matmul_dtype=matmul_dtype),
        out_shape=(jax.ShapeDtypeStruct((B, P, C, C), jnp.float32),
                   jax.ShapeDtypeStruct((B, P, C, 1), jnp.float32)),
        grid_spec=pltpu.PrefetchScalarGridSpec(
            num_scalar_prefetch=0,
            grid=(B, P, NTI),
            in_specs=[x_spec],
            out_specs=[pl.BlockSpec((1, 1, C, C), lambda b, p, n: (b, p, 0, 0)),
                       pl.BlockSpec((1, 1, C, 1), lambda b, p, n: (b, p, 0, 0))]),
        compiler_params=pltpu.CompilerParams(
            dimension_semantics=("parallel", "parallel", "arbitrary"),
            vmem_limit_bytes=vmem_limit),
    )(x_mm)

    # ---- Wrapper: tiny (C x C)-scale algebra, negligible vs the x streams.
    f32 = jnp.float32
    G = g_parts.sum(axis=1)                                   # (B, C, C)
    m = m_parts.sum(axis=1)[..., 0]                           # (B, C)
    Wg, Wp = params["w_g"].astype(f32), params["w_phi"].astype(f32)
    Wt, Ww = params["w_theta"].astype(f32), params["w_W"].astype(f32)
    bg, bp = params["b_g"].astype(f32), params["b_phi"].astype(f32)
    bt, bW = params["b_theta"].astype(f32), params["b_W"].astype(f32)
    gamma = params["bn_gamma"].astype(f32)
    beta = params["bn_beta"].astype(f32)

    # S_b = (g @ phi^T) / N reconstructed exactly from the moments.
    S = (jnp.einsum("ic,bcd,jd->bij", Wg, G, Wp)
         + jnp.einsum("ic,bc->bi", Wg, m)[:, :, None] * bp[None, None, :]
         + bg[None, :, None] * jnp.einsum("jc,bc->bj", Wp, m)[:, None, :]
         + N * bg[None, :, None] * bp[None, None, :]) * (1.0 / N)  # (B,Ci,Ci)

    # Fold theta -> attention -> W conv:   w_pre = M_b @ x + c_b.
    M = jnp.einsum("ci,bij,jd->bcd", Ww, S, Wt)               # (B, C, C)
    c = jnp.einsum("ci,bij,j->bc", Ww, S, bt) + bW[None, :]   # (B, C)

    # Training-mode BatchNorm2d batch statistics of w_pre over (B, H, W),
    # exact from the moments; centered form to limit cancellation.
    count = B * N
    Mm = jnp.einsum("bcd,bd->bc", M, m)                       # (B, C)
    mean = (Mm + N * c).sum(axis=0) / count                   # (C,)
    e = c - mean[None, :]                                     # (B, C)
    diag_MGM = jnp.einsum("bce,bce->bc",
                          jnp.einsum("bcd,bde->bce", M, G), M)
    var = jnp.maximum(
        (diag_MGM + 2.0 * e * Mm + N * e * e).sum(axis=0) / count, 0.0)
    inv_std = jax.lax.rsqrt(var + 1e-5)                       # (C,)

    scale = gamma * inv_std                                   # (C,)
    A = scale[None, :, None] * M                              # (B, C, C)
    d = (scale * e + beta[None, :])[:, :, None]               # (B, C, 1)

    # ---- Kernel 2: z = A_b @ x + d_b + x   (1 read of x, 1 write of z).
    z = pl.pallas_call(
        functools.partial(_output_kernel, matmul_dtype=matmul_dtype),
        out_shape=jax.ShapeDtypeStruct((B, C, N), jnp.float32),
        grid_spec=pltpu.PrefetchScalarGridSpec(
            num_scalar_prefetch=0,
            grid=(B, P, NTI),
            in_specs=[pl.BlockSpec((1, C, C), lambda b, p, n: (b, 0, 0)),
                      pl.BlockSpec((1, C, 1), lambda b, p, n: (b, 0, 0)),
                      x_spec],
            out_specs=pl.BlockSpec((1, C, TN),
                                   lambda b, p, n: (b, 0, p * NTI + n))),
        compiler_params=pltpu.CompilerParams(
            dimension_semantics=("parallel", "parallel", "parallel"),
            vmem_limit_bytes=vmem_limit),
    )(A, d, x_mm)

    return z.reshape(B, C, H, W)


def init_params(key, in_channels, reduc_ratio=2):
    Ci = in_channels // reduc_ratio
    ks = jax.random.split(key, 8)
    scale_in = 1.0 / jnp.sqrt(in_channels)
    scale_ci = 1.0 / jnp.sqrt(Ci)
    return {
        # 1x1 conv weights stored as (out_channels, in_channels)
        "w_g":     jax.random.uniform(ks[0], (Ci, in_channels), jnp.float32, -scale_in, scale_in),
        "b_g":     jax.random.uniform(ks[1], (Ci,), jnp.float32, -scale_in, scale_in),
        "w_theta": jax.random.uniform(ks[2], (Ci, in_channels), jnp.float32, -scale_in, scale_in),
        "b_theta": jax.random.uniform(ks[3], (Ci,), jnp.float32, -scale_in, scale_in),
        "w_phi":   jax.random.uniform(ks[4], (Ci, in_channels), jnp.float32, -scale_in, scale_in),
        "b_phi":   jax.random.uniform(ks[5], (Ci,), jnp.float32, -scale_in, scale_in),
        "w_W":     jax.random.uniform(ks[6], (in_channels, Ci), jnp.float32, -scale_ci, scale_ci),
        "b_W":     jax.random.uniform(ks[7], (in_channels,), jnp.float32, -scale_ci, scale_ci),
        # BatchNorm2d affine params: constant-initialized to 0 in the module
        "bn_gamma": jnp.zeros((in_channels,), jnp.float32),
        "bn_beta":  jnp.zeros((in_channels,), jnp.float32),
    }


def _reference(x_nchw, params):
    """Pure-JAX reference in the ORIGINAL math order (N x N attention matrix,
    two-pass BN variance) to validate the moment-based / folded kernels."""
    B, C, H, W = x_nchw.shape
    N = H * W
    x = jnp.transpose(x_nchw, (0, 2, 3, 1)).reshape(B, N, C)
    theta = x @ params["w_theta"].T + params["b_theta"]
    phi = x @ params["w_phi"].T + params["b_phi"]
    g = x @ params["w_g"].T + params["b_g"]
    f = jnp.einsum("bnc,bmc->bnm", theta, phi) / N
    y = jnp.einsum("bnm,bmc->bnc", f, g)
    w_pre = y @ params["w_W"].T + params["b_W"]
    eps = 1e-5
    mean = jnp.mean(w_pre, axis=(0, 1), keepdims=True)
    var = jnp.mean((w_pre - mean) ** 2, axis=(0, 1), keepdims=True)
    W_y = (params["bn_gamma"] * (w_pre - mean) * jax.lax.rsqrt(var + eps)
           + params["bn_beta"])
    z = W_y + x
    return jnp.transpose(z.reshape(B, H, W, C), (0, 3, 1, 2))


if __name__ == "__main__":
    key = jax.random.PRNGKey(0)
    k_x, k_p, k_g, k_b = jax.random.split(key, 4)

    B, C, H, W = 2, 4, 16, 16
    x = jax.random.normal(k_x, (B, C, H, W), jnp.float32)
    params = init_params(k_p, C)

    # Module-default init: BN gamma = beta = 0  =>  W_y == 0 and z == x.
    z = jax.block_until_ready(non_local_attention(x, params))
    z_ref = jax.block_until_ready(_reference(x, params))
    assert z.shape == (B, C, H, W)
    assert jnp.allclose(z, z_ref, atol=1e-5, rtol=1e-5)
    assert jnp.allclose(z, x, atol=1e-6)

    # General path (nonzero BN affine): validates the folded attention + BN
    # (moment-based) against the original-order N x N reference.  Tolerance is
    # loose-ish because the reassociation changes fp32 summation order, which
    # rsqrt amplifies for low-variance channels.
    params_t = dict(params)
    params_t["bn_gamma"] = jax.random.uniform(k_g, (C,), jnp.float32, 0.5, 1.5)
    params_t["bn_beta"] = jax.random.uniform(k_b, (C,), jnp.float32, -0.5, 0.5)
    z2 = jax.block_until_ready(non_local_attention(x, params_t))
    z2_ref = jax.block_until_ready(_reference(x, params_t))
    assert jnp.allclose(z2, z2_ref, atol=5e-3, rtol=5e-3)

    print("KERNEL_OK")
</pallas_src>

<mosaic_0001>
module attributes {stable_mosaic.version = 11 : i64} {
  func.func @_moments_kernel(%arg0: i32, %arg1: i32, %arg2: i32, %arg3: memref<1x4x256xf32, #tpu.memory_space<vmem>>, %arg4: memref<1x1x4x4xf32, #tpu.memory_space<vmem>>, %arg5: memref<1x1x4x1xf32, #tpu.memory_space<vmem>>) attributes {dimension_semantics = [#tpu.dimension_semantics<parallel>, #tpu.dimension_semantics<parallel>, #tpu.dimension_semantics<arbitrary>], iteration_bounds = array<i64: 2, 1, 1>, scalar_prefetch = 0 : i64, scratch_operands = 0 : i64, tpu.core_type = #tpu.core_type<tc>, window_params = [{transform_indices = @transform_0, window_bounds = array<i64: 1, 4, 256>}, {transform_indices = @transform_1, window_bounds = array<i64: 1, 1, 4, 4>}, {transform_indices = @transform_2, window_bounds = array<i64: 1, 1, 4, 1>}]} {
    %c0_i32 = arith.constant 0 : i32
    %0 = arith.cmpi eq, %arg2, %c0_i32 : i32
    %1 = arith.extui %0 : i1 to i32
    %c0_i32_0 = arith.constant 0 : i32
    %2 = arith.cmpi ne, %1, %c0_i32_0 : i32
    scf.if %2 {
      %cst_20 = arith.constant 0.000000e+00 : f32
      %20 = vector.broadcast %cst_20 : f32 to vector<1x1x4x4xf32>
      %c0_21 = arith.constant 0 : index
      %c0_22 = arith.constant 0 : index
      %c0_23 = arith.constant 0 : index
      %c0_24 = arith.constant 0 : index
      %21 = vector.load %arg4[%c0_21, %c0_22, %c0_23, %c0_24] : memref<1x1x4x4xf32, #tpu.memory_space<vmem>>, vector<1x1x4x4xf32>
      tpu.vector_store %arg4[%c0_21, %c0_22, %c0_23, %c0_24], %20 {strides = array<i32>} : memref<1x1x4x4xf32, #tpu.memory_space<vmem>>, vector<1x1x4x4xf32>,
      %cst_25 = arith.constant 0.000000e+00 : f32
      %22 = vector.broadcast %cst_25 : f32 to vector<1x1x4x1xf32>
      %c0_26 = arith.constant 0 : index
      %c0_27 = arith.constant 0 : index
      %c0_28 = arith.constant 0 : index
      %c0_29 = arith.constant 0 : index
      %23 = vector.load %arg5[%c0_26, %c0_27, %c0_28, %c0_29] : memref<1x1x4x1xf32, #tpu.memory_space<vmem>>, vector<1x1x4x1xf32>
      tpu.vector_store %arg5[%c0_26, %c0_27, %c0_28, %c0_29], %22 {strides = array<i32>} : memref<1x1x4x1xf32, #tpu.memory_space<vmem>>, vector<1x1x4x1xf32>,
    } else {
    }
    %c0 = arith.constant 0 : index
    %c0_1 = arith.constant 0 : index
    %c0_2 = arith.constant 0 : index
    %3 = vector.load %arg3[%c0, %c0_1, %c0_2] : memref<1x4x256xf32, #tpu.memory_space<vmem>>, vector<1x4x256xf32>
    %4 = vector.shape_cast %3 : vector<1x4x256xf32> to vector<4x256xf32>
    %c0_3 = arith.constant 0 : index
    %c0_4 = arith.constant 0 : index
    %c0_5 = arith.constant 0 : index
    %c0_6 = arith.constant 0 : index
    %5 = vector.load %arg4[%c0_3, %c0_4, %c0_5, %c0_6] : memref<1x1x4x4xf32, #tpu.memory_space<vmem>>, vector<1x1x4x4xf32>
    %6 = vector.shape_cast %5 : vector<1x1x4x4xf32> to vector<4x4xf32>
    %cst = arith.constant dense<0.000000e+00> : vector<4x4xf32>
    %7 = tpu.matmul %4, %4, %cst {dimension_numbers = #tpu.dot_dimension_numbers<[1], [1], [0], [0], [0, 0, 1, 0], [], []>} : vector<4x256xf32>, vector<4x256xf32>, vector<4x4xf32> -> vector<4x4xf32>
    %8 = arith.addf %6, %7 : vector<4x4xf32>
    %c0_7 = arith.constant 0 : index
    %c0_8 = arith.constant 0 : index
    %c0_9 = arith.constant 0 : index
    %c0_10 = arith.constant 0 : index
    %9 = vector.load %arg4[%c0_7, %c0_8, %c0_9, %c0_10] : memref<1x1x4x4xf32, #tpu.memory_space<vmem>>, vector<1x1x4x4xf32>
    %10 = vector.shape_cast %9 : vector<1x1x4x4xf32> to vector<4x4xf32>
    %11 = vector.shape_cast %8 : vector<4x4xf32> to vector<1x1x4x4xf32>
    tpu.vector_store %arg4[%c0_7, %c0_8, %c0_9, %c0_10], %11 {strides = array<i32>} : memref<1x1x4x4xf32, #tpu.memory_space<vmem>>, vector<1x1x4x4xf32>,
    %c0_11 = arith.constant 0 : index
    %c0_12 = arith.constant 0 : index
    %c0_13 = arith.constant 0 : index
    %c0_14 = arith.constant 0 : index
    %12 = vector.load %arg5[%c0_11, %c0_12, %c0_13, %c0_14] : memref<1x1x4x1xf32, #tpu.memory_space<vmem>>, vector<1x1x4x1xf32>
    %13 = vector.shape_cast %12 : vector<1x1x4x1xf32> to vector<4x1xf32>
    %cst_15 = arith.constant dense<0.000000e+00> : vector<4xf32>
    %14 = vector.multi_reduction <add>, %4, %cst_15 [1] : vector<4x256xf32> to vector<4xf32>
    %15 = vector.shape_cast %14 : vector<4xf32> to vector<4x1xf32>
    %16 = arith.addf %13, %15 : vector<4x1xf32>
    %c0_16 = arith.constant 0 : index
    %c0_17 = arith.constant 0 : index
    %c0_18 = arith.constant 0 : index
    %c0_19 = arith.constant 0 : index
    %17 = vector.load %arg5[%c0_16, %c0_17, %c0_18, %c0_19] : memref<1x1x4x1xf32, #tpu.memory_space<vmem>>, vector<1x1x4x1xf32>
    %18 = vector.shape_cast %17 : vector<1x1x4x1xf32> to vector<4x1xf32>
    %19 = vector.shape_cast %16 : vector<4x1xf32> to vector<1x1x4x1xf32>
    tpu.vector_store %arg5[%c0_16, %c0_17, %c0_18, %c0_19], %19 {strides = array<i32>} : memref<1x1x4x1xf32, #tpu.memory_space<vmem>>, vector<1x1x4x1xf32>,
    return
  }
  func.func @transform_0(%arg0: i32, %arg1: i32, %arg2: i32) -> (i32, i32, i32) {
    %c1_i32 = arith.constant 1 : i32
    %0 = arith.muli %arg1, %c1_i32 : i32
    %1 = arith.addi %0, %arg2 : i32
    %c0_i32 = arith.constant 0 : i32
    %c0_i32_0 = arith.constant 0 : i32
    return %arg0, %c0_i32, %1 : i32, i32, i32
  }
  func.func @transform_1(%arg0: i32, %arg1: i32, %arg2: i32) -> (i32, i32, i32, i32) {
    %c0_i32 = arith.constant 0 : i32
    %c0_i32_0 = arith.constant 0 : i32
    %c0_i32_1 = arith.constant 0 : i32
    return %arg0, %arg1, %c0_i32, %c0_i32_0 : i32, i32, i32, i32
  }
  func.func @transform_2(%arg0: i32, %arg1: i32, %arg2: i32) -> (i32, i32, i32, i32) {
    %c0_i32 = arith.constant 0 : i32
    %c0_i32_0 = arith.constant 0 : i32
    %c0_i32_1 = arith.constant 0 : i32
    return %arg0, %arg1, %c0_i32, %c0_i32_0 : i32, i32, i32, i32
  }
}

</mosaic_0001>

<bundles_post_ra>
// kernel: tpu_custom_call.1
= control target key start
LH: loop header
LB: loop body
LE: loop exit
PB: predicated region body
PF: predicated region fallthrough
CT: control target
= control target key end

     0   :  { %8 = vsyncpa [#allocation3], 0  ;;  %s771_s0 = inlined_call_operand.hbm [shape: f32[2,4,256], index: 0, kind: input, shape index: {}]   ;;  %s772_s1 = inlined_call_operand.hbm [shape: f32[2,1,4,4], index: 1, kind: output, shape index: {0}]   ;;  %s773_s2 = inlined_call_operand.vmem [shape: f32[2,1,4,1], index: 2, kind: output, shape index: {1}]  }
   0x1   :  { %10 = vsyncpa [#allocation3 + $0x1], 0 }
   0x2   :  { %11 = vsyncpa [#allocation4], 0 }
   0x3   :  { %13 = vsyncpa [#allocation4 + $0x1], 0  ;;  %s643_s9 = smov 0   ;;  %s645_s10 = smov 0  }
   0x4   :  { %s647_s11 = smov 0   ;;  %s649_s12 = smov 0  }
   0x5   :  { %s651_s13 = smov 0   ;;  %s653_s14 = smov 0  }
   0x6 LB: > { %s434_s15 = sadd.s32 4294967295, %s625_s14   ;;  %s435_s16 = sadd.s32 4294967294, %s625_s14   ;;  %s625_s14 = sphi %s653_s14, %s19_s14   ;;  %s621_s13 = sphi %s651_s13, %s782_s13   ;;  %s617_s12 = sphi %s649_s12, %s781_s12   ;;  %s613_s11 = sphi %s647_s11, %s780_s11   ;;  %s609_s10 = sphi %s645_s10, %s779_s10   ;;  %s605_s9 = sphi %s643_s9, %s778_s9  }
   0x7   : > { %s38_s17 = sadd.s32 1, %s621_s13  ;;  %s49_s18 = sadd.s32 1, %s613_s11 }
   0x8   : > { %p40_p0 = scmp.ge.s32.totalorder %s38_s17, 2  ;;  %p56_p1 = scmp.ne.s32.totalorder %s613_s11, %s609_s10 }
   0x9   : > { %p57_p2 = scmp.eq.s32.totalorder %s625_s14, 0  ;;  %p62_p3 = scmp.ne.s32.totalorder %s609_s10, %s605_s9 }
   0xa   : > { %s784_s17 = smov (%p40_p0, %s38_s17), 0  ;;  %p63_p5 = scmp.eq.s32.totalorder %s434_s15, 0 }
   0xb   : > { %p684_p4 = por %p57_p2, %p56_p1  ;;  %s44_s20 = ssub.s32 %s621_s13, %s784_s17 }
   0xc   : > { %p88_p6 = scmp.eq.s32.totalorder %s434_s15, 1  ;;  %p47_p7 = scmp.eq.s32.totalorder %s44_s20, 0 }
   0xd   : > { %p690_p8 = por %p63_p5, %p62_p3  ;;  %p94_p10 = scmp.eq.s32.totalorder %s435_s16, 1 }
   0xe   : > { %p694_p9 = por %p88_p6, %p56_p1  ;;  %p437_p12 = scmp.ge.s32.totalorder %s625_s14, 2 }
   0xf   : > { %s699_s23 = scalar_select %p47_p7, %s613_s11, %s49_s18  }
  0x10   : > { %p701_p11 = por %p94_p10, %p62_p3  ;;  %p462_p13 = scmp.lt.s32.totalorder %s625_s14, 2 }
  0x11   : > { %s142_s25 = sand.u32 1, %s613_s11   ;;  %s449_s27 = sshll.u32 %s621_s13, 3 }
  0x12   : > { %s438_s26 = sshll.u32 %s142_s25, 3  ;;  %s154_s30 = scalar_lea.hbm %s771_s0, %s449_s27 }
  0x13   : > { %s146_s3 = scalar_lea.vmem [#allocation2], %s438_s26  ;;  %s156_s5 = sshll.u32 %s154_s30, 4  ;;  %s157_s5 = int_to_ptr.hbm [resolvable:$true] %s156_s5 }
  0x14   : > { %s158_s4 = sshll.u32 %s146_s3, 4  ;;  %p455_p0 = pnand %p462_p13, %p684_p4  ;;  %s159_s4 = int_to_ptr.vmem [resolvable:$true] %s158_s4 }
  0x15   : > { %p441_p1 = scmp.ge.s32.totalorder %s625_s14, 1  ;;  %p163_p2 = scmp.lt.s32.totalorder %s625_s14, 3 }
  0x16   : > { %s143_s6 = scalar_lea.sflag [#allocation3], %s142_s25 }
  0x17   : > { %457 = dma.hbm_to_vmem [thread:$0]  (!%p455_p0), %s157_s5, 128, %s159_s4, %s143_s6  }
  0x18   : > { %p164_p3 = pnand %p441_p1, %p163_p2 }
  0x19   : > { %s717_s7 = sand.u32 (!%p164_p3), 1, %s609_s10  }
  0x1a   : > { %167 = sbr.rel (%p164_p3) target bundleno = 185 (0xb9), region = 24  ;;  %s442_s8 = sshll.u32 (!%p164_p3), %s717_s7, 3 }
  0x1b   : > { %s170_s15 = scalar_lea.sflag (!%p164_p3), [#allocation3], %s717_s7  ;;  %s173_s16 = scalar_lea.vmem (!%p164_p3), [#allocation2], %s442_s8 }
  0x1f   : > { %596 = dma.done.wait (%p690_p8), %s170_s15, 128  }
  0x20   : > { %598 = vsyncadd (%p690_p8), %s170_s15, 4294967168  ;;  %v219_v0 = vld [vmem:[%s173_s16] sm:$0xff]  ;;  %vm281_vm0 = vcmask 1043456   ;;  %p204_p4 = scmp.lt.s32.totalorder %s617_s12, 1  ;;  %s443_s19 = sshll.u32 %s717_s7, 2  ;;  %vm215_vm1 = vcmask 27648  }
  0x21   : > { %222 = vst [vmem:[#allocation1] ss:$2 sm:$0xff] %v219_v0  ;;  %s192_s27 = scalar_lea.vmem [#allocation5], %s443_s19  ;;  %v627_v10 = vmov 0.0   ;;  %vm217_vm2 = vcmask 3072   ;;  %s446_s28 = sshll.u32 %s617_s12, 2 }
  0x22   : > { %s205_s18 = scalar_select %p204_p4, %s617_s12, 1  ;;  %216 = vst.msk [vmem:[%s192_s27] sm:$0xf] %vm215_vm1, %v627_v10 }
  0x23   : > { %s309_s3 = scalar_lea.hbm %s772_s1, %s446_s28  ;;  %s311_s4 = sshll.u32 %s192_s27, 4  ;;  %s312_s4 = int_to_ptr.vmem [resolvable:$true] %s311_s4 }
  0x24   : > { %s444_s20 = sshll.u32 %s205_s18, 2  ;;  %s313_s5 = sshll.u32 %s309_s3, 4  ;;  %s314_s5 = int_to_ptr.hbm [resolvable:$true] %s313_s5 }
  0x25   : > { %s210_s26 = scalar_lea.vmem %s773_s2, %s444_s20  ;;  %s291_s12 = scalar_lea.sflag [#allocation4], %s717_s7 }
  0x26   : > { %218 = vst.msk [vmem:[%s210_s26] sm:$0xf] %vm217_vm2, %v627_v10  ;;  %s557_s6 = sshra.s32 %s314_s5, 4  ;;  %s563_s18 = scalar_lea.hbm %s772_s1, 8  ;;  %s558_s6 = int_to_ptr.hbm [resolvable:$true] %s557_s6 }
  0x27   : > { %s559_s8 = scalar_lea.hbm %s558_s6, 4  ;;  %p564_p8 = scmp.lt.s32.totalorder %s558_s6, %s772_s1 }
  0x28   : > { %v223_v1 = vld.sshfl [vmem:[#allocation1] sm:$0xff pattern:$0x75316420]  ;;  %v224_v2 = vld.sshfl [vmem:[#allocation1 + $0x8] sm:$0xff pattern:$0x75316420]  ;;  %p560_p5 = scmp.ne.s32.totalorder %s558_s6, %s559_s8  ;;  %p565_p10 = scmp.lt.s32.totalorder %s563_s18, %s559_s8 }
  0x29   : > { %227 = vst [vmem:[#allocation1] ss:$2 sm:$0xff] %v219_v0  ;;  %v220_v15 = vld [vmem:[%s192_s27] sm:$0xf] }
  0x2a   : > { %p561_p6 = pnand %p560_p5, %p694_p9  ;;  %p566_p13 = por %p565_p10, %p564_p8 }
  0x2c   : > { %p562_p7 = pneg %p561_p6 }
  0x2d   : > { %v275_v11 = vld [vmem:[%s210_s26] sm:$0xf] }
  0x2e   : > { %p567_p0 = pnand %p566_p13, %p562_p7 }
  0x30   : > { %v228_v3 = vld.sshfl [vmem:[#allocation1] sm:$0xff pattern:$0x75316420]  ;;  %v229_v4 = vld.sshfl [vmem:[#allocation1 + $0x8] sm:$0xff pattern:$0x75316420] }
  0x31   : > { %247 = vmatpush.xpose.msra.mxu0 %v228_v3  ;;  %267 = vmatpush.xpose.msra.mxu1 %v229_v4  ;;  %276 = vst [vmem:[#allocation1] ss:$2 sm:$0xff] %v219_v0 }
  0x34   : > { %248 = vmatmul.f32.vlgmr.msra.gmra.mxu0 %v223_v1  ;;  %268 = vmatmul.f32.vlgmr.msra.gmra.mxu1 %v224_v2 }
  0x38   : > { %v277_v5 = vld.sshfl [vmem:[#allocation1] sm:$0xff pattern:$0x75316420]  ;;  %v278_v6 = vld.sshfl [vmem:[#allocation1 + $0x8] sm:$0xff pattern:$0x75316420] }
  0x39   : > { %v282_v7 = vsel %vm281_vm0, %v277_v5, 0.0  ;;  %v283_v8 = vsel %vm281_vm0, %v278_v6, 0.0 }
  0x3a   : > { %v284_v9 = vadd.f32 %v283_v8, %v282_v7 }
  0x3c   : > { %285 = vadd.xlane.f32.xlu0 %v284_v9 }
  0xaf   : > { %v286_v12 = vpop.xlane.xlu0 %285 }
  0xb0   : > { %v287_v13 = vadd.f32 %v286_v12, %v275_v11 }
  0xb1   : > { %v249_v14 = vpop.f32.mrf.mxu0  ;;  %v269_v16 = vpop.f32.mrf.mxu1 }
  0xb2   : > { %v270_v17 = vadd.f32 %v269_v16, %v249_v14  ;;  %289 = vst.msk [vmem:[%s210_s26] sm:$0xf] %vm217_vm2, %v287_v13 }
  0xb4   : > { %v272_v18 = vadd.f32 %v270_v17, %v220_v15 }
  0xb6   : > { %274 = vst.msk [vmem:[%s192_s27] sm:$0xf] %vm215_vm1, %v272_v18 }
  0xb7   : > { %570 = shalt.err (!%p567_p0)
}
  0xb8   : > { %452 = dma.vmem_to_hbm [thread:$0]  (%p694_p9), %s312_s4, 64, %s314_s5, %s291_s12  }
  0xb9 PF: > { %s328_s7 = sand.u32 1, %s605_s9   ;;  %p459_p1 = pnand %p437_p12, %p701_p11 }
  0xba   : > { %s329_s21 = scalar_lea.sflag [#allocation4], %s328_s7 }
  0xbb   : > { %p460_p2 = pneg %p459_p1 }
  0xbd   : > { %600 = dma.done.wait (%p460_p2), %s329_s21, 64  }
  0xbe   : > { %602 = vsyncadd (%p460_p2), %s329_s21, 4294967232  ;;  %s19_s14 = sadd.s32 1, %s625_s14   ;;  %s778_s9 = smov %s609_s10 }
  0xbf   : > { %p16_p3 = scmp.ge.s32.totalorder %s19_s14, 4   ;;  %s779_s10 = smov %s613_s11 }
  0xc0   : > { %s780_s11 = smov %s699_s23  ;;  %s781_s12 = smov %s621_s13 }
  0xc1   : > { %s782_s13 = smov %s784_s17  ;;  %18 = sbr.rel (!%p16_p3) target bundleno = 6 (0x6), region = 85 }
  0xc6   :  { %345 = vsyncpa [#allocation3], 1 }
  0xc7   :  { %347 = vsyncpa [#allocation3 + $0x1], 1 }
  0xc8   :  { %348 = vsyncpa [#allocation4], 1 }
  0xc9   :  { %350 = vsyncpa [#allocation4 + $0x1], 1 }

</bundles_post_ra>
